<compile_context>
chip_gen: v5e
topology: v5e:2x2
jax: 0.10.0
libtpu: 0.0.40
codegen_flags: <defaults>
</compile_context>

<pallas_src>
import jax
import jax.numpy as jnp
from jax.experimental import pallas as pl
from jax.experimental.pallas import tpu as pltpu


def _mlp_kernel(x_ref, w1_ref, b1_ref, w2_ref, b2_ref, out_ref):
    """One batch tile of  l2(relu(l1(x)))  with out_features == 1."""
    # l1: MXU matmul with f32 accumulation. Cast x to the weight dtype so the
    # optional bf16 weight path works without code changes (no-op for f32).
    x = x_ref[...].astype(w1_ref.dtype)                      # (tile_b, D_in)
    h = jnp.dot(x, w1_ref[...], preferred_element_type=jnp.float32)
    # bias + ReLU in f32 on the VPU.
    h = jnp.maximum(h + b1_ref[...], 0.0)                    # (tile_b, H)
    # l2 (out_features == 1): an N=1 matmul would use 1/128..1/256 of the MXU,
    # so do it on the VPU (mul) + XLU (lane reduce) instead — frees the MXU.
    y = jnp.sum(h * w2_ref[...], axis=-1, keepdims=True)     # (tile_b, 1)
    y = y + b2_ref[0, 0]                                     # scalar bias (SMEM)
    out_ref[...] = y.astype(out_ref.dtype)


def nnetwork_forward(x, w1, b1, w2, b2, *, tile_b=None, use_bf16_matmul=False):
    """Forward pass of NNetwork via a single batch-gridded Pallas TPU kernel.

    Args:
      x : (B, D_in)  float32
      w1: (D_in, H)  float32   (PyTorch l1.weight.T)
      b1: (1, H)     float32   (PyTorch l1.bias)
      w2: (1, H)     float32   (PyTorch l2.weight, native layout)
      b2: (1, 1)     float32   (PyTorch l2.bias)
    Returns:
      (B, 1) array with x.dtype.
    """
    B, d_in = x.shape
    h_dim = w1.shape[1]
    assert w1.shape == (d_in, h_dim)
    assert b1.shape == (1, h_dim)
    assert w2.shape == (1, h_dim)
    assert b2.shape == (1, 1)

    if use_bf16_matmul:
        # v6e/v7x fast-MXU path (f32 accumulation is kept inside the kernel).
        w1 = w1.astype(jnp.bfloat16)

    if tile_b is None:
        # 256-aligned M tiles fill the 256-wide MXU on v6e/v7x (and are
        # 128-aligned for v5e); small batches use a single full block.
        tile_b = 256 if B > 256 else B
    tile_b = min(tile_b, B)
    if tile_b != B:
        # Second-minor block dim must be a multiple of 8 unless it spans the array.
        tile_b = max(8, (tile_b // 8) * 8)

    grid = (pl.cdiv(B, tile_b),)

    # Rough VMEM budget: double-buffered x/out tiles + resident weights + h.
    # Floor at 32 MiB, cap at 48 MiB to leave headroom on v7x (64 MiB physical).
    w_itemsize = jnp.dtype(w1.dtype).itemsize
    vmem_est = (
        2 * tile_b * d_in * x.dtype.itemsize      # x tiles (double buffered)
        + 2 * tile_b * 1 * x.dtype.itemsize       # out tiles (double buffered)
        + d_in * h_dim * w_itemsize               # resident w1
        + 2 * h_dim * 4                           # resident b1, w2
        + tile_b * h_dim * 4                      # intermediate h (f32)
    )
    vmem_limit = int(min(max(2 * vmem_est, 32 * 1024 * 1024), 48 * 1024 * 1024))

    return pl.pallas_call(
        _mlp_kernel,
        out_shape=jax.ShapeDtypeStruct((B, 1), x.dtype),
        grid=grid,
        in_specs=[
            pl.BlockSpec((tile_b, d_in), lambda i: (i, 0)),     # x: tiled on batch
            pl.BlockSpec((d_in, h_dim), lambda i: (0, 0)),      # w1: VMEM resident
            pl.BlockSpec((1, h_dim), lambda i: (0, 0)),         # b1: VMEM resident
            pl.BlockSpec((1, h_dim), lambda i: (0, 0)),         # w2: VMEM resident
            pl.BlockSpec(memory_space=pltpu.MemorySpace.SMEM),  # b2: scalar in SMEM
        ],
        out_specs=pl.BlockSpec((tile_b, 1), lambda i: (i, 0)),
        compiler_params=pltpu.CompilerParams(
            dimension_semantics=("parallel",),   # batch tiles are independent
            vmem_limit_bytes=vmem_limit,
        ),
    )(x, w1, b1, w2, b2)


def init_params(key, input_size, hidden_size):
    """Deterministic parameter init mirroring nn.Linear's shapes.

    PyTorch l1.weight: (hidden, input) -> stored as W1 = weight.T : (input, hidden)
    PyTorch l2.weight: (1, hidden)     -> stored as-is           : (1, hidden)
    """
    k1, k2, k3, k4 = jax.random.split(key, 4)
    bound1 = 1.0 / jnp.sqrt(input_size)
    bound2 = 1.0 / jnp.sqrt(hidden_size)
    w1 = jax.random.uniform(k1, (input_size, hidden_size), jnp.float32,
                            -bound1, bound1)
    b1 = jax.random.uniform(k2, (1, hidden_size), jnp.float32, -bound1, bound1)
    w2 = jax.random.uniform(k3, (1, hidden_size), jnp.float32, -bound2, bound2)
    b2 = jax.random.uniform(k4, (1, 1), jnp.float32, -bound2, bound2)
    return w1, b1, w2, b2


def _reference(x, w1, b1, w2, b2):
    """Pure-JAX reference of the same math (full f32 precision)."""
    h = jnp.maximum(
        jnp.dot(x, w1, precision=jax.lax.Precision.HIGHEST) + b1, 0.0)
    return jnp.dot(h, w2.T, precision=jax.lax.Precision.HIGHEST) + b2


if __name__ == "__main__":
    # Small shapes consistent with the module's forward: (batch, input_size).
    batch, input_size, hidden_size = 8, 16, 32

    key = jax.random.PRNGKey(0)
    kx, kp = jax.random.split(key)
    x = jax.random.normal(kx, (batch, input_size), jnp.float32)
    w1, b1, w2, b2 = init_params(kp, input_size, hidden_size)

    out = jax.block_until_ready(nnetwork_forward(x, w1, b1, w2, b2))
    ref = _reference(x, w1, b1, w2, b2)
    assert out.shape == (batch, 1)
    assert jnp.allclose(out, ref, atol=1e-4, rtol=1e-4), \
        float(jnp.max(jnp.abs(out - ref)))

    # Larger shape: exercises the batch grid (2 tiles) with resident weights.
    B2, D2, H2 = 512, 128, 256
    kx2, kp2 = jax.random.split(jax.random.PRNGKey(0), 2)
    x2 = jax.random.normal(kx2, (B2, D2), jnp.float32)
    p2 = init_params(kp2, D2, H2)
    out2 = jax.block_until_ready(nnetwork_forward(x2, *p2, tile_b=256))
    ref2 = _reference(x2, *p2)
    assert out2.shape == (B2, 1)
    assert jnp.allclose(out2, ref2, atol=1e-4, rtol=1e-4), \
        float(jnp.max(jnp.abs(out2 - ref2)))

    print("KERNEL_OK")
</pallas_src>

<mosaic_0001>
module attributes {stable_mosaic.version = 11 : i64} {
  func.func @_mlp_kernel(%arg0: i32, %arg1: memref<8x16xf32, #tpu.memory_space<vmem>>, %arg2: memref<16x32xf32, #tpu.memory_space<vmem>>, %arg3: memref<1x32xf32, #tpu.memory_space<vmem>>, %arg4: memref<1x32xf32, #tpu.memory_space<vmem>>, %arg5: memref<1x1xf32, #tpu.memory_space<smem>>, %arg6: memref<8x1xf32, #tpu.memory_space<vmem>>) attributes {dimension_semantics = [#tpu.dimension_semantics<parallel>], iteration_bounds = array<i64: 1>, scalar_prefetch = 0 : i64, scratch_operands = 0 : i64, tpu.core_type = #tpu.core_type<tc>, window_params = [{transform_indices = @transform_0, window_bounds = array<i64: 8, 16>}, {pipeline_mode = #tpu.pipeline_mode<synchronous>, transform_indices = @transform_1, window_bounds = array<i64: 16, 32>}, {pipeline_mode = #tpu.pipeline_mode<synchronous>, transform_indices = @transform_2, window_bounds = array<i64: 1, 32>}, {pipeline_mode = #tpu.pipeline_mode<synchronous>, transform_indices = @transform_3, window_bounds = array<i64: 1, 32>}, {transform_indices = @transform_4, window_bounds = array<i64: 1, 1>}, {transform_indices = @transform_5, window_bounds = array<i64: 8, 1>}]} {
    %c0 = arith.constant 0 : index
    %c0_0 = arith.constant 0 : index
    %0 = vector.load %arg1[%c0, %c0_0] : memref<8x16xf32, #tpu.memory_space<vmem>>, vector<8x16xf32>
    %c0_1 = arith.constant 0 : index
    %c0_2 = arith.constant 0 : index
    %1 = vector.load %arg2[%c0_1, %c0_2] : memref<16x32xf32, #tpu.memory_space<vmem>>, vector<16x32xf32>
    %cst = arith.constant dense<0.000000e+00> : vector<8x32xf32>
    %2 = tpu.matmul %0, %1, %cst {dimension_numbers = #tpu.dot_dimension_numbers<[1], [0], [0], [1], [0, 0, 1, 1], [], []>} : vector<8x16xf32>, vector<16x32xf32>, vector<8x32xf32> -> vector<8x32xf32>
    %c0_3 = arith.constant 0 : index
    %c0_4 = arith.constant 0 : index
    %3 = vector.load %arg3[%c0_3, %c0_4] : memref<1x32xf32, #tpu.memory_space<vmem>>, vector<1x32xf32>
    %4 = vector.broadcast %3 : vector<1x32xf32> to vector<8x32xf32>
    %5 = arith.addf %2, %4 : vector<8x32xf32>
    %cst_5 = arith.constant 0.000000e+00 : f32
    %6 = vector.broadcast %cst_5 : f32 to vector<8x32xf32>
    %7 = arith.maximumf %5, %6 : vector<8x32xf32>
    %c0_6 = arith.constant 0 : index
    %c0_7 = arith.constant 0 : index
    %8 = vector.load %arg4[%c0_6, %c0_7] : memref<1x32xf32, #tpu.memory_space<vmem>>, vector<1x32xf32>
    %9 = vector.broadcast %8 : vector<1x32xf32> to vector<8x32xf32>
    %10 = arith.mulf %7, %9 : vector<8x32xf32>
    %cst_8 = arith.constant dense<0.000000e+00> : vector<8xf32>
    %11 = vector.multi_reduction <add>, %10, %cst_8 [1] : vector<8x32xf32> to vector<8xf32>
    %12 = vector.shape_cast %11 : vector<8xf32> to vector<8x1xf32>
    %c0_9 = arith.constant 0 : index
    %c0_10 = arith.constant 0 : index
    %13 = memref.load %arg5[%c0_9, %c0_10] : memref<1x1xf32, #tpu.memory_space<smem>>
    %14 = vector.broadcast %13 : f32 to vector<8x1xf32>
    %15 = arith.addf %12, %14 : vector<8x1xf32>
    %c0_11 = arith.constant 0 : index
    %c0_12 = arith.constant 0 : index
    %16 = vector.load %arg6[%c0_11, %c0_12] : memref<8x1xf32, #tpu.memory_space<vmem>>, vector<8x1xf32>
    tpu.vector_store %arg6[%c0_11, %c0_12], %15 {strides = array<i32>} : memref<8x1xf32, #tpu.memory_space<vmem>>, vector<8x1xf32>,
    return
  }
  func.func @transform_0(%arg0: i32) -> (i32, i32) {
    %c0_i32 = arith.constant 0 : i32
    %c0_i32_0 = arith.constant 0 : i32
    return %arg0, %c0_i32 : i32, i32
  }
  func.func @transform_1(%arg0: i32) -> (i32, i32) {
    %c0_i32 = arith.constant 0 : i32
    %c0_i32_0 = arith.constant 0 : i32
    %c0_i32_1 = arith.constant 0 : i32
    return %c0_i32, %c0_i32_0 : i32, i32
  }
  func.func @transform_2(%arg0: i32) -> (i32, i32) {
    %c0_i32 = arith.constant 0 : i32
    %c0_i32_0 = arith.constant 0 : i32
    %c0_i32_1 = arith.constant 0 : i32
    return %c0_i32, %c0_i32_0 : i32, i32
  }
  func.func @transform_3(%arg0: i32) -> (i32, i32) {
    %c0_i32 = arith.constant 0 : i32
    %c0_i32_0 = arith.constant 0 : i32
    %c0_i32_1 = arith.constant 0 : i32
    return %c0_i32, %c0_i32_0 : i32, i32
  }
  func.func @transform_4(%arg0: i32) -> (i32, i32) {
    %c0_i32 = arith.constant 0 : i32
    %c0_i32_0 = arith.constant 0 : i32
    %c0_i32_1 = arith.constant 0 : i32
    return %c0_i32, %c0_i32_0 : i32, i32
  }
  func.func @transform_5(%arg0: i32) -> (i32, i32) {
    %c0_i32 = arith.constant 0 : i32
    %c0_i32_0 = arith.constant 0 : i32
    return %arg0, %c0_i32 : i32, i32
  }
}

</mosaic_0001>

<bundles_post_ra>
// kernel: tpu_custom_call.1
= control target key start
LH: loop header
LB: loop body
LE: loop exit
PB: predicated region body
PF: predicated region fallthrough
CT: control target
= control target key end

     0   :  { %11 = vsyncpa [#allocation4], 0  ;;  %s214_s0 = inlined_call_operand.hbm [shape: f32[8,16], index: 0, kind: input, shape index: {}]   ;;  %s215_s1 = inlined_call_operand.hbm [shape: f32[16,32], index: 1, kind: input, shape index: {}]   ;;  %s216_s2 = inlined_call_operand.vmem [shape: f32[1,32], index: 2, kind: input, shape index: {}]   ;;  %s217_s3 = inlined_call_operand.vmem [shape: f32[1,32], index: 3, kind: input, shape index: {}]   ;;  %s218_s4 = inlined_call_operand.<no memory space> [shape: f32[1,1], index: 4, kind: input, shape index: {}]   ;;  %s219_s5 = inlined_call_operand.vmem [shape: f32[8,1], index: 5, kind: output, shape index: {}]  }
   0x1   :  { %s18_s20 = sshll.u32 %s214_s0, 4  ;;  %s19_s20 = int_to_ptr.hbm [resolvable:$true] %s18_s20 }
   0x2   :  { %12 = vsyncpa [#allocation6], 0  ;;  %s162_s21 = smov [#allocation3]   ;;  %s28_s25 = sshll.u32 %s215_s1, 4  ;;  %s29_s25 = int_to_ptr.hbm [resolvable:$true] %s28_s25 }
   0x3   :  { %s20_s22 = sshll.u32 %s162_s21, 4  ;;  %s163_s26 = smov [#allocation5]   ;;  %s21_s22 = int_to_ptr.vmem [resolvable:$true] %s20_s22 }
   0x4   :  { %23 = dma.hbm_to_vmem [thread:$0]  %s19_s20, 128, %s21_s22, [#allocation4]  }
   0x5   :  { %s30_s27 = sshll.u32 %s163_s26, 4  ;;  %s164_s28 = smov 128   ;;  %s31_s27 = int_to_ptr.vmem [resolvable:$true] %s30_s27 }
   0x6   :  { %s165_s29 = smov 8  }
   0x7   :  { %36 = dma.hbm_to_vmem [thread:$0]  %s29_s25, 256, %s31_s27, [#allocation6], %s164_s28, %s164_s28, %s165_s29  }
   0x8   :  { %158 = dma.done.wait [#allocation4], 128  }
   0x9   :  { %159 = vsyncadd [#allocation4], 4294967168 }
   0xa   :  { %160 = dma.done.wait [#allocation6], 256  }
   0xb   :  { %161 = vsyncadd [#allocation6], 4294967040  ;;  %v53_v0 = vld [vmem:[#allocation5 + $0x8] sm:$0xff]  ;;  %v52_v1 = vld [vmem:[#allocation5] sm:$0xff]  ;;  %vm58_vm0 = vcmask 130048   ;;  %vm88_vm1 = vcmask 261120   ;;  %v93_v10 = vstv %s218_s4 }
   0xc   :  { %76 = vmatpush.msra.mxu0 %v53_v0  ;;  %v51_v2 = vld [vmem:[#allocation3] sm:$0xff]  ;;  %vm95_vm2 = vcmask 7168  }
   0xd   :  { %v108_v3 = vld [vmem:[%s216_s2] ss:$0 sm:$0xff] }
   0xe   :  { %77 = vmatpush.msra.mxu0 %v52_v1  ;;  %v109_v6 = vld [vmem:[%s217_s3] ss:$0 sm:$0xff] }
   0xf   :  { %103 = vmatmul.msk.f32.vlgmr.msra.gmra.mxu0 %vm58_vm0, %v51_v2 }
  0x8c   :  { %v79_v4 = vpop.f32.mrf.mxu0 }
  0x8d   :  { %v80_v5 = vadd.f32 %v108_v3, %v79_v4 }
  0x8f   :  { %v82_v7 = vmax.f32 %v80_v5, 0.0 }
  0x91   :  { %v87_v8 = vmul.f32 %v109_v6, %v82_v7 }
  0x93   :  { %v89_v9 = vsel %vm88_vm1, %v87_v8, 0.0 }
  0x94   :  { %90 = vadd.xlane.f32.xlu0 %v89_v9 }
 0x107   :  { %v91_v11 = vpop.xlane.xlu0 %90 }
 0x108   :  { %v94_v12 = vadd.f32 %v93_v10, %v91_v11 }
 0x10a   :  { %96 = vst.msk [vmem:[%s219_s5] sm:$0xff] %vm95_vm2, %v94_v12 }
 0x10b   :  { %101 = vsyncpa [#allocation4], 1 }
 0x10c   :  { %102 = vsyncpa [#allocation6], 1 }

</bundles_post_ra>
